<compile_context>
chip_gen: v7x
topology: tpu7x:2x2x1
jax: 0.10.0
libtpu: 0.0.40
codegen_flags: <defaults>
</compile_context>

<pallas_src>
import functools

import jax
import jax.numpy as jnp
from jax.experimental import pallas as pl
from jax.experimental.pallas import tpu as pltpu


def _five_crop_kernel(img_ref, out_ref, *, offsets, crop_size):
    """img_ref: (Bt, C, H, W) VMEM block; out_ref: (5, Bt, C, cs, cs) VMEM block."""
    cs = crop_size
    for idx, (r, c0) in enumerate(offsets):
        # Static slices per crop -> plain VMEM copies, no control flow needed.
        out_ref[idx, ...] = img_ref[:, :, r:r + cs, c0:c0 + cs]


def _round_up(x, m):
    return (x + m - 1) // m * m


def _pick_batch_tile(b, c, h, w, cs, itemsize, budget_bytes=8 << 20):
    """Largest divisor of b whose double-buffered in/out blocks fit the budget."""
    # Account for (sublane=8, lane=128) VMEM padding of the last two dims.
    in_bytes = c * _round_up(h, 8) * _round_up(w, 128) * itemsize
    out_bytes = 5 * c * _round_up(cs, 8) * _round_up(cs, 128) * itemsize
    per_img = 2 * (in_bytes + out_bytes)  # input + output, both double-buffered
    bt = int(max(1, min(b, budget_bytes // max(per_img, 1))))
    while b % bt:
        bt -= 1
    return bt


def corner_center_crop(imgs: jax.Array, crop_size: int) -> jax.Array:
    """JAX/Pallas equivalent of CornerCenterCrop.forward."""
    b, c, h, w = imgs.shape
    cs = int(crop_size)
    if cs > h or cs > w:
        raise ValueError("crop_size must fit inside the image")

    # torchvision five_crop offsets (row, col): tl, tr, bl, br, center.
    ct = int(round((h - cs) / 2.0))
    cl = int(round((w - cs) / 2.0))
    offsets = (
        (0, 0),            # top-left
        (0, w - cs),       # top-right
        (h - cs, 0),       # bottom-left
        (h - cs, w - cs),  # bottom-right
        (ct, cl),          # center
    )

    bt = _pick_batch_tile(b, c, h, w, cs, jnp.dtype(imgs.dtype).itemsize)
    kernel = functools.partial(_five_crop_kernel, offsets=offsets, crop_size=cs)

    grid_spec = pl.GridSpec(
        grid=(b // bt,),
        in_specs=[
            # One batch tile of full images, fetched exactly once per step.
            pl.BlockSpec((bt, c, h, w), lambda i: (i, 0, 0, 0)),
        ],
        # All five crops of this batch tile land in one output block.
        out_specs=pl.BlockSpec((5, bt, c, cs, cs), lambda i: (0, i, 0, 0, 0)),
    )

    out5 = pl.pallas_call(
        kernel,
        grid_spec=grid_spec,
        out_shape=jax.ShapeDtypeStruct((5, b, c, cs, cs), imgs.dtype),
        compiler_params=pltpu.CompilerParams(
            dimension_semantics=("parallel",),
        ),
    )(imgs)

    # (5, B, C, cs, cs) -> (5*B, C, cs, cs): merging the two leading axes is a
    # metadata-only reshape and reproduces torch.concat([tl, tr, bl, br, ce], 0).
    return out5.reshape(5 * b, c, cs, cs)


def _reference_five_crop(imgs: jax.Array, crop_size: int) -> jax.Array:
    """Pure-JAX reference mirroring torchvision F.five_crop + concat."""
    b, c, h, w = imgs.shape
    cs = crop_size
    ct = int(round((h - cs) / 2.0))
    cl = int(round((w - cs) / 2.0))
    tl = imgs[:, :, 0:cs, 0:cs]
    tr = imgs[:, :, 0:cs, w - cs:w]
    bl = imgs[:, :, h - cs:h, 0:cs]
    br = imgs[:, :, h - cs:h, w - cs:w]
    ce = imgs[:, :, ct:ct + cs, cl:cl + cs]
    return jnp.concatenate([tl, tr, bl, br, ce], axis=0)


if __name__ == "__main__":
    key = jax.random.PRNGKey(0)
    B, C, H, W = 2, 4, 16, 16
    CROP = 8

    imgs = jax.random.normal(key, (B, C, H, W), dtype=jnp.float32)

    out = jax.block_until_ready(corner_center_crop(imgs, CROP))

    ref = _reference_five_crop(imgs, CROP)
    assert out.shape == (5 * B, C, CROP, CROP), out.shape
    assert jnp.allclose(out, ref), "Pallas five_crop mismatch vs reference"

    print("KERNEL_OK")
</pallas_src>

<mosaic_0001>
module attributes {stable_mosaic.version = 11 : i64} {
  func.func @_five_crop_kernel(%arg0: i32, %arg1: memref<2x4x16x16xf32, #tpu.memory_space<vmem>>, %arg2: memref<5x2x4x8x8xf32, #tpu.memory_space<vmem>>) attributes {dimension_semantics = [#tpu.dimension_semantics<parallel>], iteration_bounds = array<i64: 1>, scalar_prefetch = 0 : i64, scratch_operands = 0 : i64, tpu.core_type = #tpu.core_type<tc>, window_params = [{transform_indices = @transform_0, window_bounds = array<i64: 2, 4, 16, 16>}, {transform_indices = @transform_1, window_bounds = array<i64: 5, 2, 4, 8, 8>}]} {
    %c0 = arith.constant 0 : index
    %c0_0 = arith.constant 0 : index
    %c0_1 = arith.constant 0 : index
    %c0_2 = arith.constant 0 : index
    %0 = vector.load %arg1[%c0, %c0_0, %c0_1, %c0_2] : memref<2x4x16x16xf32, #tpu.memory_space<vmem>>, vector<2x4x8x8xf32>
    %c0_3 = arith.constant 0 : index
    %c0_4 = arith.constant 0 : index
    %c0_5 = arith.constant 0 : index
    %c0_6 = arith.constant 0 : index
    %c0_7 = arith.constant 0 : index
    %1 = vector.load %arg2[%c0_3, %c0_4, %c0_5, %c0_6, %c0_7] : memref<5x2x4x8x8xf32, #tpu.memory_space<vmem>>, vector<1x2x4x8x8xf32>
    %2 = vector.shape_cast %1 : vector<1x2x4x8x8xf32> to vector<2x4x8x8xf32>
    %3 = vector.shape_cast %0 : vector<2x4x8x8xf32> to vector<1x2x4x8x8xf32>
    tpu.vector_store %arg2[%c0_3, %c0_4, %c0_5, %c0_6, %c0_7], %3 {strides = array<i32>} : memref<5x2x4x8x8xf32, #tpu.memory_space<vmem>>, vector<1x2x4x8x8xf32>,
    %c0_8 = arith.constant 0 : index
    %c0_9 = arith.constant 0 : index
    %c0_10 = arith.constant 0 : index
    %c8 = arith.constant 8 : index
    %4 = vector.load %arg1[%c0_8, %c0_9, %c0_10, %c8] : memref<2x4x16x16xf32, #tpu.memory_space<vmem>>, vector<2x4x8x8xf32>
    %c1 = arith.constant 1 : index
    %c0_11 = arith.constant 0 : index
    %c0_12 = arith.constant 0 : index
    %c0_13 = arith.constant 0 : index
    %c0_14 = arith.constant 0 : index
    %5 = vector.load %arg2[%c1, %c0_11, %c0_12, %c0_13, %c0_14] : memref<5x2x4x8x8xf32, #tpu.memory_space<vmem>>, vector<1x2x4x8x8xf32>
    %6 = vector.shape_cast %5 : vector<1x2x4x8x8xf32> to vector<2x4x8x8xf32>
    %7 = vector.shape_cast %4 : vector<2x4x8x8xf32> to vector<1x2x4x8x8xf32>
    tpu.vector_store %arg2[%c1, %c0_11, %c0_12, %c0_13, %c0_14], %7 {strides = array<i32>} : memref<5x2x4x8x8xf32, #tpu.memory_space<vmem>>, vector<1x2x4x8x8xf32>,
    %c0_15 = arith.constant 0 : index
    %c0_16 = arith.constant 0 : index
    %c8_17 = arith.constant 8 : index
    %c0_18 = arith.constant 0 : index
    %8 = vector.load %arg1[%c0_15, %c0_16, %c8_17, %c0_18] : memref<2x4x16x16xf32, #tpu.memory_space<vmem>>, vector<2x4x8x8xf32>
    %c2 = arith.constant 2 : index
    %c0_19 = arith.constant 0 : index
    %c0_20 = arith.constant 0 : index
    %c0_21 = arith.constant 0 : index
    %c0_22 = arith.constant 0 : index
    %9 = vector.load %arg2[%c2, %c0_19, %c0_20, %c0_21, %c0_22] : memref<5x2x4x8x8xf32, #tpu.memory_space<vmem>>, vector<1x2x4x8x8xf32>
    %10 = vector.shape_cast %9 : vector<1x2x4x8x8xf32> to vector<2x4x8x8xf32>
    %11 = vector.shape_cast %8 : vector<2x4x8x8xf32> to vector<1x2x4x8x8xf32>
    tpu.vector_store %arg2[%c2, %c0_19, %c0_20, %c0_21, %c0_22], %11 {strides = array<i32>} : memref<5x2x4x8x8xf32, #tpu.memory_space<vmem>>, vector<1x2x4x8x8xf32>,
    %c0_23 = arith.constant 0 : index
    %c0_24 = arith.constant 0 : index
    %c8_25 = arith.constant 8 : index
    %c8_26 = arith.constant 8 : index
    %12 = vector.load %arg1[%c0_23, %c0_24, %c8_25, %c8_26] : memref<2x4x16x16xf32, #tpu.memory_space<vmem>>, vector<2x4x8x8xf32>
    %c3 = arith.constant 3 : index
    %c0_27 = arith.constant 0 : index
    %c0_28 = arith.constant 0 : index
    %c0_29 = arith.constant 0 : index
    %c0_30 = arith.constant 0 : index
    %13 = vector.load %arg2[%c3, %c0_27, %c0_28, %c0_29, %c0_30] : memref<5x2x4x8x8xf32, #tpu.memory_space<vmem>>, vector<1x2x4x8x8xf32>
    %14 = vector.shape_cast %13 : vector<1x2x4x8x8xf32> to vector<2x4x8x8xf32>
    %15 = vector.shape_cast %12 : vector<2x4x8x8xf32> to vector<1x2x4x8x8xf32>
    tpu.vector_store %arg2[%c3, %c0_27, %c0_28, %c0_29, %c0_30], %15 {strides = array<i32>} : memref<5x2x4x8x8xf32, #tpu.memory_space<vmem>>, vector<1x2x4x8x8xf32>,
    %c0_31 = arith.constant 0 : index
    %c0_32 = arith.constant 0 : index
    %c4 = arith.constant 4 : index
    %c4_33 = arith.constant 4 : index
    %16 = vector.load %arg1[%c0_31, %c0_32, %c4, %c4_33] : memref<2x4x16x16xf32, #tpu.memory_space<vmem>>, vector<2x4x8x8xf32>
    %c4_34 = arith.constant 4 : index
    %c0_35 = arith.constant 0 : index
    %c0_36 = arith.constant 0 : index
    %c0_37 = arith.constant 0 : index
    %c0_38 = arith.constant 0 : index
    %17 = vector.load %arg2[%c4_34, %c0_35, %c0_36, %c0_37, %c0_38] : memref<5x2x4x8x8xf32, #tpu.memory_space<vmem>>, vector<1x2x4x8x8xf32>
    %18 = vector.shape_cast %17 : vector<1x2x4x8x8xf32> to vector<2x4x8x8xf32>
    %19 = vector.shape_cast %16 : vector<2x4x8x8xf32> to vector<1x2x4x8x8xf32>
    tpu.vector_store %arg2[%c4_34, %c0_35, %c0_36, %c0_37, %c0_38], %19 {strides = array<i32>} : memref<5x2x4x8x8xf32, #tpu.memory_space<vmem>>, vector<1x2x4x8x8xf32>,
    return
  }
  func.func @transform_0(%arg0: i32) -> (i32, i32, i32, i32) {
    %c0_i32 = arith.constant 0 : i32
    %c0_i32_0 = arith.constant 0 : i32
    %c0_i32_1 = arith.constant 0 : i32
    %c0_i32_2 = arith.constant 0 : i32
    return %arg0, %c0_i32, %c0_i32_0, %c0_i32_1 : i32, i32, i32, i32
  }
  func.func @transform_1(%arg0: i32) -> (i32, i32, i32, i32, i32) {
    %c0_i32 = arith.constant 0 : i32
    %c0_i32_0 = arith.constant 0 : i32
    %c0_i32_1 = arith.constant 0 : i32
    %c0_i32_2 = arith.constant 0 : i32
    %c0_i32_3 = arith.constant 0 : i32
    return %c0_i32, %arg0, %c0_i32_0, %c0_i32_1, %c0_i32_2 : i32, i32, i32, i32, i32
  }
}

</mosaic_0001>

<bundles_post_ra>
// kernel: tpu_custom_call.1
= control target key start
LH: loop header
LB: loop body
LE: loop exit
PB: predicated region body
PF: predicated region fallthrough
CT: control target
= control target key end

     0   :  { %6 = vsyncpa [#allocation3], 0  ;;  %s377_s0 = inlined_call_operand.hbm [shape: f32[2,4,16,16], index: 0, kind: input, shape index: {}]   ;;  %s378_s1 = inlined_call_operand.hbm [shape: f32[5,2,4,8,8], index: 1, kind: output, shape index: {}]  }
   0x1   :  { %7 = vsyncpa [#allocation4], 0  ;;  %s275_s6 = smov [#allocation2]   ;;  %s227_s10 = scalar_lea.hbm %s377_s0, 2048 }
   0x2   :  { %s13_s7 = sshll.u32 %s275_s6, 4  ;;  %p228_p0 = scmp.ne.s32.totalorder %s377_s0, %s227_s10  ;;  %s14_s7 = int_to_ptr.vmem [resolvable:$true] %s13_s7 }
   0x3   :  { %p231_p1 = scmp.lt.u32.totalorder %s227_s10, %s377_s0 }
   0x5   :  { %p233_p2 = pnand %p231_p1, %p228_p0 }
   0x7   :  { %236 = shalt.err (!%p233_p2)
}
   0x8   :  { %s237_s15 = scalar_lea.vmem %s14_s7, 2048  ;;  %p242_p4 = scmp.lt.s32.totalorder %s14_s7, %s14_s7 }
   0x9   :  { %p238_p3 = scmp.ne.s32.totalorder %s14_s7, %s237_s15  ;;  %p243_p5 = scmp.lt.s32.totalorder %s237_s15, %s237_s15 }
   0xb   :  { %p244_p6 = por %p243_p5, %p242_p4 }
   0xd   :  { %p245_p7 = pnand %p244_p6, %p238_p3 }
   0xf   :  { %248 = shalt.err (!%p245_p7)
}
  0x10   :  { %s276_s16 = smov 128   ;;  %s277_s17 = smov 8  }
  0x11   :  { %19 = dma.hbm_to_vmem [thread:$0]  %s377_s0, 2048, %s14_s7, [#allocation3], %s276_s16, %s276_s16, %s277_s17  }
  0x12   :  { %271 = dma.done.wait [#allocation3], 2048  }
  0x13   :  { %272 = vsyncadd [#allocation3], 4294965248  ;;  %v42_v0 = vld [vmem:[#allocation2 + $0x20] sm:$0xff]  ;;  %v43_v2 = vld [vmem:[#allocation2 + $0x30] sm:$0xff]  ;;  %vm31_vm0 = vcmask 64512   ;;  %s278_s20 = smov 120  }
  0x14   :  { %v40_v1 = vld [vmem:[#allocation2] sm:$0xff]  ;;  %60 = vrot.lane.b32.xlu1 %v42_v0, %s278_s20  ;;  %v41_v3 = vld [vmem:[#allocation2 + $0x10] sm:$0xff]  ;;  %34 = vst.msk [vmem:[#allocation5 + $0x10] sm:$0xff] %vm31_vm0, %v42_v0  ;;  %35 = vst.msk [vmem:[#allocation5 + $0x18] sm:$0xff] %vm31_vm0, %v43_v2  ;;  %s279_s0 = smov 124   ;;  %s280_s21 = smov [#allocation5]  }
  0x15   :  { %56 = vrot.lane.b32.xlu0 %v40_v1, %s278_s20  ;;  %v45_v4 = vld [vmem:[#allocation2 + $0x50] sm:$0xff]  ;;  %v44_v5 = vld [vmem:[#allocation2 + $0x40] sm:$0xff]  ;;  %32 = vst.msk [vmem:[#allocation5] sm:$0xff] %vm31_vm0, %v40_v1  ;;  %v107_v8 = vld [vmem:[#allocation2 + $0x18] sm:$0xff]  ;;  %s209_s22 = sshll.u32 %s280_s21, 4  ;;  %s210_s22 = int_to_ptr.vmem [resolvable:$true] %s209_s22 }
  0x16   :  { %v47_v6 = vld [vmem:[#allocation2 + $0x70] sm:$0xff]  ;;  %v46_v7 = vld [vmem:[#allocation2 + $0x60] sm:$0xff]  ;;  %33 = vst.msk [vmem:[#allocation5 + $0x8] sm:$0xff] %vm31_vm0, %v41_v3  ;;  %36 = vst.msk [vmem:[#allocation5 + $0x20] sm:$0xff] %vm31_vm0, %v44_v5  ;;  %s249_s23 = scalar_lea.vmem %s210_s22, 5120  ;;  %p254_p9 = scmp.lt.s32.totalorder %s210_s22, %s210_s22 }
  0x17   :  { %37 = vst.msk [vmem:[#allocation5 + $0x28] sm:$0xff] %vm31_vm0, %v45_v4  ;;  %v106_v9 = vld [vmem:[#allocation2 + $0x8] sm:$0xff]  ;;  %v109_v10 = vld [vmem:[#allocation2 + $0x38] sm:$0xff]  ;;  %38 = vst.msk [vmem:[#allocation5 + $0x30] sm:$0xff] %vm31_vm0, %v46_v7  ;;  %p250_p8 = scmp.ne.s32.totalorder %s210_s22, %s249_s23  ;;  %p255_p10 = scmp.lt.s32.totalorder %s249_s23, %s249_s23 }
  0x18   :  { %v108_v11 = vld [vmem:[#allocation2 + $0x28] sm:$0xff]  ;;  %39 = vst.msk [vmem:[#allocation5 + $0x38] sm:$0xff] %vm31_vm0, %v47_v6  ;;  %99 = vst.msk [vmem:[#allocation5 + $0x88] sm:$0xff] %vm31_vm0, %v107_v8  ;;  %v111_v12 = vld [vmem:[#allocation2 + $0x58] sm:$0xff]  ;;  %62 = vrot.lane.b32.xlu1 %v43_v2, %s278_s20 }
  0x19   :  { %v110_v13 = vld [vmem:[#allocation2 + $0x48] sm:$0xff]  ;;  %v113_v14 = vld [vmem:[#allocation2 + $0x78] sm:$0xff]  ;;  %98 = vst.msk [vmem:[#allocation5 + $0x80] sm:$0xff] %vm31_vm0, %v106_v9  ;;  %100 = vst.msk [vmem:[#allocation5 + $0x90] sm:$0xff] %vm31_vm0, %v108_v11  ;;  %58 = vrot.lane.b32.xlu0 %v41_v3, %s278_s20  ;;  %p256_p11 = por %p255_p10, %p254_p9 }
  0x1a   :  { %101 = vst.msk [vmem:[#allocation5 + $0x98] sm:$0xff] %vm31_vm0, %v109_v10  ;;  %v112_v15 = vld [vmem:[#allocation2 + $0x68] sm:$0xff]  ;;  %102 = vst.msk [vmem:[#allocation5 + $0xa0] sm:$0xff] %vm31_vm0, %v110_v13  ;;  %v156_v16 = vld [vmem:[#allocation2 + $0x14] sm:$0xff] }
  0x1b   :  { %103 = vst.msk [vmem:[#allocation5 + $0xa8] sm:$0xff] %vm31_vm0, %v111_v12  ;;  %105 = vst.msk [vmem:[#allocation5 + $0xb8] sm:$0xff] %vm31_vm0, %v113_v14  ;;  %v155_v17 = vld [vmem:[#allocation2 + $0x4] sm:$0xff]  ;;  %v158_v18 = vld [vmem:[#allocation2 + $0x34] sm:$0xff]  ;;  %p257_p12 = pnand %p256_p11, %p250_p8 }
  0x1c   :  { %104 = vst.msk [vmem:[#allocation5 + $0xb0] sm:$0xff] %vm31_vm0, %v112_v15  ;;  %66 = vrot.lane.b32.xlu1 %v45_v4, %s278_s20  ;;  %v157_v19 = vld [vmem:[#allocation2 + $0x24] sm:$0xff]  ;;  %v160_v20 = vld [vmem:[#allocation2 + $0x54] sm:$0xff] }
  0x1d   :  { %64 = vrot.lane.b32.xlu0 %v44_v5, %s278_s20  ;;  %v159_v21 = vld [vmem:[#allocation2 + $0x44] sm:$0xff]  ;;  %v162_v22 = vld [vmem:[#allocation2 + $0x74] sm:$0xff] }
  0x1e   :  { %v161_v23 = vld [vmem:[#allocation2 + $0x64] sm:$0xff] }
  0x20   :  { %70 = vrot.lane.b32.xlu1 %v47_v6, %s278_s20 }
  0x21   :  { %68 = vrot.lane.b32.xlu0 %v46_v7, %s278_s20 }
  0x24   :  { %124 = vrot.lane.b32.xlu1 %v107_v8, %s278_s20 }
  0x25   :  { %122 = vrot.lane.b32.xlu0 %v106_v9, %s278_s20 }
  0x28   :  { %128 = vrot.lane.b32.xlu1 %v109_v10, %s278_s20 }
  0x29   :  { %126 = vrot.lane.b32.xlu0 %v108_v11, %s278_s20 }
  0x2c   :  { %132 = vrot.lane.b32.xlu1 %v111_v12, %s278_s20 }
  0x2d   :  { %130 = vrot.lane.b32.xlu0 %v110_v13, %s278_s20 }
  0x30   :  { %136 = vrot.lane.b32.xlu1 %v113_v14, %s278_s20 }
  0x31   :  { %134 = vrot.lane.b32.xlu0 %v112_v15, %s278_s20 }
  0x34   :  { %173 = vrot.lane.b32.xlu1 %v156_v16, %s279_s0 }
  0x35   :  { %171 = vrot.lane.b32.xlu0 %v155_v17, %s279_s0 }
  0x38   :  { %177 = vrot.lane.b32.xlu1 %v158_v18, %s279_s0 }
  0x39   :  { %175 = vrot.lane.b32.xlu0 %v157_v19, %s279_s0 }
  0x3c   :  { %181 = vrot.lane.b32.xlu1 %v160_v20, %s279_s0 }
  0x3d   :  { %179 = vrot.lane.b32.xlu0 %v159_v21, %s279_s0 }
  0x40   :  { %185 = vrot.lane.b32.xlu1 %v162_v22, %s279_s0 }
  0x41   :  { %183 = vrot.lane.b32.xlu0 %v161_v23, %s279_s0 }
  0x86   :  { %v61_v24 = vpop.permute.xlu1 %60 }
  0x87   :  { %v57_v25 = vpop.permute.xlu0 %56  ;;  %83 = vst.msk [vmem:[#allocation5 + $0x50] sm:$0xff] %vm31_vm0, %v61_v24 }
  0x88   :  { %81 = vst.msk [vmem:[#allocation5 + $0x40] sm:$0xff] %vm31_vm0, %v57_v25 }
  0x8a   :  { %v63_v26 = vpop.permute.xlu1 %62 }
  0x8b   :  { %v59_v27 = vpop.permute.xlu0 %58  ;;  %84 = vst.msk [vmem:[#allocation5 + $0x58] sm:$0xff] %vm31_vm0, %v63_v26 }
  0x8c   :  { %82 = vst.msk [vmem:[#allocation5 + $0x48] sm:$0xff] %vm31_vm0, %v59_v27 }
  0x8e   :  { %v67_v28 = vpop.permute.xlu1 %66 }
  0x8f   :  { %v65_v29 = vpop.permute.xlu0 %64  ;;  %86 = vst.msk [vmem:[#allocation5 + $0x68] sm:$0xff] %vm31_vm0, %v67_v28 }
  0x90   :  { %85 = vst.msk [vmem:[#allocation5 + $0x60] sm:$0xff] %vm31_vm0, %v65_v29 }
  0x92   :  { %v71_v30 = vpop.permute.xlu1 %70 }
  0x93   :  { %v69_v31 = vpop.permute.xlu0 %68  ;;  %88 = vst.msk [vmem:[#allocation5 + $0x78] sm:$0xff] %vm31_vm0, %v71_v30 }
  0x94   :  { %87 = vst.msk [vmem:[#allocation5 + $0x70] sm:$0xff] %vm31_vm0, %v69_v31 }
  0x96   :  { %v125_v32 = vpop.permute.xlu1 %124 }
  0x97   :  { %v123_v33 = vpop.permute.xlu0 %122  ;;  %148 = vst.msk [vmem:[#allocation5 + $0xc8] sm:$0xff] %vm31_vm0, %v125_v32 }
  0x98   :  { %147 = vst.msk [vmem:[#allocation5 + $0xc0] sm:$0xff] %vm31_vm0, %v123_v33 }
  0x9a   :  { %v129_v34 = vpop.permute.xlu1 %128 }
  0x9b   :  { %v127_v35 = vpop.permute.xlu0 %126  ;;  %150 = vst.msk [vmem:[#allocation5 + $0xd8] sm:$0xff] %vm31_vm0, %v129_v34 }
  0x9c   :  { %149 = vst.msk [vmem:[#allocation5 + $0xd0] sm:$0xff] %vm31_vm0, %v127_v35 }
  0x9e   :  { %v133_v36 = vpop.permute.xlu1 %132 }
  0x9f   :  { %v131_v37 = vpop.permute.xlu0 %130  ;;  %152 = vst.msk [vmem:[#allocation5 + $0xe8] sm:$0xff] %vm31_vm0, %v133_v36 }
  0xa0   :  { %151 = vst.msk [vmem:[#allocation5 + $0xe0] sm:$0xff] %vm31_vm0, %v131_v37 }
  0xa2   :  { %v137_v38 = vpop.permute.xlu1 %136 }
  0xa3   :  { %v135_v39 = vpop.permute.xlu0 %134  ;;  %154 = vst.msk [vmem:[#allocation5 + $0xf8] sm:$0xff] %vm31_vm0, %v137_v38 }
  0xa4   :  { %153 = vst.msk [vmem:[#allocation5 + $0xf0] sm:$0xff] %vm31_vm0, %v135_v39 }
  0xa6   :  { %v174_v40 = vpop.permute.xlu1 %173 }
  0xa7   :  { %v172_v41 = vpop.permute.xlu0 %171  ;;  %197 = vst.msk [vmem:[#allocation5 + $0x108] sm:$0xff] %vm31_vm0, %v174_v40 }
  0xa8   :  { %196 = vst.msk [vmem:[#allocation5 + $0x100] sm:$0xff] %vm31_vm0, %v172_v41 }
  0xaa   :  { %v178_v42 = vpop.permute.xlu1 %177 }
  0xab   :  { %v176_v43 = vpop.permute.xlu0 %175  ;;  %199 = vst.msk [vmem:[#allocation5 + $0x118] sm:$0xff] %vm31_vm0, %v178_v42 }
  0xac   :  { %198 = vst.msk [vmem:[#allocation5 + $0x110] sm:$0xff] %vm31_vm0, %v176_v43 }
  0xae   :  { %v182_v44 = vpop.permute.xlu1 %181 }
  0xaf   :  { %v180_v45 = vpop.permute.xlu0 %179  ;;  %201 = vst.msk [vmem:[#allocation5 + $0x128] sm:$0xff] %vm31_vm0, %v182_v44 }
  0xb0   :  { %200 = vst.msk [vmem:[#allocation5 + $0x120] sm:$0xff] %vm31_vm0, %v180_v45 }
  0xb2   :  { %v186_v46 = vpop.permute.xlu1 %185 }
  0xb3   :  { %v184_v47 = vpop.permute.xlu0 %183  ;;  %203 = vst.msk [vmem:[#allocation5 + $0x138] sm:$0xff] %vm31_vm0, %v186_v46 }
  0xb4   :  { %202 = vst.msk [vmem:[#allocation5 + $0x130] sm:$0xff] %vm31_vm0, %v184_v47 }
  0xb5   :  { %260 = shalt.err (!%p257_p12)
}
  0xb6   :  { %s261_s26 = scalar_lea.hbm %s378_s1, 5120 }
  0xb7   :  { %p262_p13 = scmp.ne.s32.totalorder %s378_s1, %s261_s26  ;;  %p265_p0 = scmp.lt.u32.totalorder %s261_s26, %s378_s1 }
  0xb9   :  { %p267_p1 = pnand %p265_p0, %p262_p13 }
  0xbb   :  { %270 = shalt.err (!%p267_p1)
}
  0xbc   :  { %215 = dma.vmem_to_hbm [thread:$0]  %s210_s22, 5120, %s378_s1, [#allocation4], %s276_s16, %s276_s16, %s277_s17  }
  0xbd   :  { %273 = dma.done.wait [#allocation4], 5120  }
  0xbe   :  { %274 = vsyncadd [#allocation4], 4294962176 }
  0xbf   :  { %219 = vsyncpa [#allocation3], 1 }
  0xc0   :  { %220 = vsyncpa [#allocation4], 1 }

</bundles_post_ra>
